<compile_context>
chip_gen: v6e
topology: v6e:2x2x1
jax: 0.10.0
libtpu: 0.0.40
codegen_flags: <defaults>
</compile_context>

<pallas_src>
import functools

import jax
import jax.numpy as jnp
import numpy as np
from jax.experimental import pallas as pl
from jax.experimental.pallas import tpu as pltpu


# ----------------------------- config ---------------------------------------
CFG = {
    "pose": {
        "layers_feat": [11, 32, 32, 32, 3],   # -> L = [(11,32),(32,32),(32,32),(32,3)]
        "skip": [2],
        "max_index": 8,
    }
}
INPUT_T_DIM = 11
PE_L = 5
MIN_INDEX = 0.0


def get_layer_dims(layers):
    return list(zip(layers[:-1], layers[1:]))


def _round_up(v, m):
    return ((v + m - 1) // m) * m


# ----------------------------- Pallas kernel --------------------------------
def rotsnet_kernel(x_ref, wenc_ref, whid_ref, b_ref, out_ref, *,
                   max_index, min_index, hidden, out_dim):
    x = x_ref[...]                                              # (1, T) raw index
    xn = 2.0 * (x - min_index) / (max_index - min_index) - 1.0  # normalized index

    # Encoder RHS block (12, T): rows = [xn, sin(pi*2^k*xn) k<5, cos(...) k<5, 1]
    # cos = sin(. + pi/2) -> one fused EUP sin over the whole block; the xn and
    # ones rows are patched in with VPU selects (free slots).
    nrows = 2 * PE_L + 2
    r = jax.lax.broadcasted_iota(jnp.int32, (nrows, 1), 0)      # (12, 1)
    k = jnp.maximum(jnp.where(r >= 1 + PE_L, r - 1 - PE_L, r - 1), 0)
    freq = jnp.left_shift(1, k).astype(jnp.float32) * np.float32(np.pi)   # pi*2^k
    phase = jnp.where(r >= 1 + PE_L, np.float32(np.pi / 2.0), np.float32(0.0))
    base = jnp.sin(freq * xn + phase)                           # (12, T), one sin
    enc = jnp.where(r == 0, xn,
                    jnp.where(r == nrows - 1, np.float32(1.0), base))

    # Stacked encoder matmul: rows 0:hidden -> layer-0 preact (b0 folded),
    # rows hidden:2*hidden -> layer-2 skip contribution (b2 folded).
    e = jnp.dot(wenc_ref[...], enc, preferred_element_type=jnp.float32)   # (64, T)

    w1 = whid_ref[0:hidden, :]                                  # (32, 32)
    w2h = whid_ref[hidden:2 * hidden, :]                        # (32, 32)
    w3 = whid_ref[2 * hidden:2 * hidden + out_dim, :]           # (3, 32)
    b1 = b_ref[0:hidden, :]                                     # (32, 1)
    b3 = b_ref[hidden:hidden + out_dim, :]                      # (3, 1)

    h = jnp.maximum(e[0:hidden], 0.0)                           # layer 0, ReLU
    h = jnp.maximum(jnp.dot(w1, h, preferred_element_type=jnp.float32)
                    + b1, 0.0)                                  # layer 1, ReLU
    h = jnp.maximum(jnp.dot(w2h, h, preferred_element_type=jnp.float32)
                    + e[hidden:2 * hidden], 0.0)                # layer 2 (skip), ReLU
    out_ref[...] = (jnp.dot(w3, h, preferred_element_type=jnp.float32)
                    + b3)                                       # layer 3, no act.


def rotsnet_forward_pallas(index, params, cfg, tile_n=8192, out_layout="n3"):
    """index: (N,) int/float. Returns (N, 3) f32 ("n3", default, matches the
    PyTorch module) or the lane-dense (3, N) ("3n", avoids the XLA transpose)."""
    max_index = float(cfg["pose"]["max_index"])
    x = index.reshape(1, -1).astype(jnp.float32)                # (1, N), batch on lanes
    n = x.shape[1]

    # Batch tile: large to amortize per-step overhead, but keep >= 2 grid steps
    # on big batches so v7x megacore can shard the "parallel" axis.
    tile_n = _round_up(max(int(tile_n), 128), 128)
    n128 = _round_up(n, 128)
    tile = min(tile_n, n128)
    if tile == n128 and n128 >= 2048:
        tile = _round_up(pl.cdiv(n128, 2), 128)
    n_pad = pl.cdiv(n, tile) * tile
    if n_pad != n:
        x = jnp.pad(x, ((0, 0), (0, n_pad - n)))
    grid = (n_pad // tile,)

    (w0, b0), (w1, b1), (w2, b2), (w3, b3) = params
    hidden = w1.shape[0]            # 32
    out_dim = w3.shape[1]           # 3

    # --- host-side weight packing ---------------------------------------------
    # stored weights are (in, out); points_enc feature order = [x, sin0..4, cos0..4].
    #  w_enc (2*hidden, 12) : [ layer0 W.T | b0 ; layer2 enc-part W.T | b2 ]
    #  w_hid (2*hidden+3,32): [ W1.T ; W2_h.T ; W3.T ]
    #  b_slab (hidden+3, 1) : [ b1 ; b3 ]
    w_enc = jnp.concatenate(
        [jnp.concatenate([w0.T, b0.reshape(-1, 1)], axis=1),
         jnp.concatenate([w2[hidden:].T, b2.reshape(-1, 1)], axis=1)], axis=0)
    w_hid = jnp.concatenate([w1.T, w2[:hidden].T, w3.T], axis=0)
    b_slab = jnp.concatenate([b1.reshape(-1, 1), b3.reshape(-1, 1)], axis=0)

    kernel = functools.partial(rotsnet_kernel, max_index=max_index,
                               min_index=MIN_INDEX, hidden=hidden,
                               out_dim=out_dim)

    macs_per_elem = 2 * hidden * (2 * PE_L + 2) + 2 * hidden * hidden + out_dim * hidden
    weight_bytes = 4 * int(w_enc.size + w_hid.size + b_slab.size)
    cost = pl.CostEstimate(
        flops=2 * macs_per_elem * n_pad,
        transcendentals=(2 * PE_L + 2) * n_pad,
        bytes_accessed=(1 + out_dim) * 4 * n_pad + weight_bytes)

    def const_spec(a):
        # full-array block, resident in VMEM across the whole grid
        return pl.BlockSpec(a.shape, lambda i: (0, 0))

    out = pl.pallas_call(
        kernel,
        out_shape=jax.ShapeDtypeStruct((out_dim, n_pad), jnp.float32),
        grid=grid,
        in_specs=[pl.BlockSpec((1, tile), lambda i: (0, i)),
                  const_spec(w_enc), const_spec(w_hid), const_spec(b_slab)],
        out_specs=pl.BlockSpec((out_dim, tile), lambda i: (0, i)),
        compiler_params=pltpu.CompilerParams(
            dimension_semantics=("parallel",),
            vmem_limit_bytes=32 * 1024 * 1024),
        cost_estimate=cost,
    )(x, w_enc, w_hid, b_slab)

    out = out[:, :n]
    if out_layout == "3n":
        # Lane-dense layout; prefer this if the consumer can take (3, N): the
        # (3,N)->(N,3) transpose below moves more HBM bytes than the kernel itself.
        return out
    return out.T                                                # (N, 3)


# ----------------------------- parameter init -------------------------------
def init_params(cfg, key):
    """Mimics tensorflow_init_weights: xavier_uniform for hidden layers,
    uniform(0, 1e-6) for the last layer, zero biases. Weights stored (in, out)."""
    L = get_layer_dims(cfg["pose"]["layers_feat"])
    params = []
    for li, (k_in, k_out) in enumerate(L):
        if li == 0:
            k_in = INPUT_T_DIM
        if li in cfg["pose"]["skip"]:
            k_in += INPUT_T_DIM
        if li == len(L) - 1:
            k_out = 3
        key, sub = jax.random.split(key)
        if li == len(L) - 1:
            w = jax.random.uniform(sub, (k_in, k_out), jnp.float32,
                                   minval=0.0, maxval=1e-6)
        else:
            limit = float(np.sqrt(6.0 / (k_in + k_out)))
            w = jax.random.uniform(sub, (k_in, k_out), jnp.float32,
                                   minval=-limit, maxval=limit)
        b = jnp.zeros((k_out,), jnp.float32)
        params.append((w, b))
    return params


# ----------------------------- pure-JAX reference ----------------------------
def rotsnet_forward_ref(index, params, cfg):
    max_index = float(cfg["pose"]["max_index"])
    x = index.reshape(-1, 1).astype(jnp.float32)
    xn = 2.0 * (x - MIN_INDEX) / (max_index - MIN_INDEX) - 1.0
    freq = (2.0 ** jnp.arange(PE_L, dtype=jnp.float32)) * np.pi
    spec = xn[..., None] * freq                                   # (N,1,5)
    enc = jnp.stack([jnp.sin(spec), jnp.cos(spec)], axis=-2)      # (N,1,2,5)
    enc = enc.reshape(x.shape[0], -1)                             # (N,10)
    pe = jnp.concatenate([xn, enc], axis=-1)                      # (N,11)
    feat = pe
    skip = cfg["pose"]["skip"]
    for li, (w, b) in enumerate(params):
        if li in skip:
            feat = jnp.concatenate([feat, pe], axis=-1)
        feat = feat @ w + b
        if li != len(params) - 1:
            feat = jax.nn.relu(feat)
    return feat


# ----------------------------- main ------------------------------------------
if __name__ == "__main__":
    key = jax.random.PRNGKey(0)
    key, pkey, ikey = jax.random.split(key, 3)

    params = init_params(CFG, pkey)

    # small deterministic input: 8 frame indices in [0, max_index)
    index = jax.random.randint(ikey, (8,), 0, CFG["pose"]["max_index"]).astype(jnp.int32)

    out = rotsnet_forward_pallas(index, params, CFG)
    out = jax.block_until_ready(out)

    ref = jax.block_until_ready(rotsnet_forward_ref(index, params, CFG))

    assert out.shape == (8, 3), out.shape
    np.testing.assert_allclose(np.asarray(out), np.asarray(ref), rtol=1e-5, atol=1e-5)
    print("KERNEL_OK")
</pallas_src>

<mosaic_0001>
module attributes {stable_mosaic.version = 11 : i64} {
  func.func @rotsnet_kernel(%arg0: i32, %arg1: memref<1x128xf32, #tpu.memory_space<vmem>>, %arg2: memref<64x12xf32, #tpu.memory_space<vmem>>, %arg3: memref<67x32xf32, #tpu.memory_space<vmem>>, %arg4: memref<35x1xf32, #tpu.memory_space<vmem>>, %arg5: memref<3x128xf32, #tpu.memory_space<vmem>>) attributes {dimension_semantics = [#tpu.dimension_semantics<parallel>], iteration_bounds = array<i64: 1>, scalar_prefetch = 0 : i64, scratch_operands = 0 : i64, tpu.core_type = #tpu.core_type<tc>, window_params = [{transform_indices = @transform_0, window_bounds = array<i64: 1, 128>}, {pipeline_mode = #tpu.pipeline_mode<synchronous>, transform_indices = @transform_1, window_bounds = array<i64: 64, 12>}, {pipeline_mode = #tpu.pipeline_mode<synchronous>, transform_indices = @transform_2, window_bounds = array<i64: 67, 32>}, {pipeline_mode = #tpu.pipeline_mode<synchronous>, transform_indices = @transform_3, window_bounds = array<i64: 35, 1>}, {transform_indices = @transform_4, window_bounds = array<i64: 3, 128>}]} {
    %c0 = arith.constant 0 : index
    %c0_0 = arith.constant 0 : index
    %0 = vector.load %arg1[%c0, %c0_0] : memref<1x128xf32, #tpu.memory_space<vmem>>, vector<1x128xf32>
    %cst = arith.constant 0.000000e+00 : f32
    %1 = vector.broadcast %cst : f32 to vector<1x128xf32>
    %2 = arith.subf %0, %1 : vector<1x128xf32>
    %cst_1 = arith.constant 2.000000e+00 : f32
    %3 = vector.broadcast %cst_1 : f32 to vector<1x128xf32>
    %4 = arith.mulf %3, %2 : vector<1x128xf32>
    %cst_2 = arith.constant 8.000000e+00 : f32
    %5 = vector.broadcast %cst_2 : f32 to vector<1x128xf32>
    %6 = arith.divf %4, %5 : vector<1x128xf32>
    %cst_3 = arith.constant 1.000000e+00 : f32
    %7 = vector.broadcast %cst_3 : f32 to vector<1x128xf32>
    %8 = arith.subf %6, %7 : vector<1x128xf32>
    %9 = tpu.iota {dimensions = array<i32: 0>} : vector<12x1xi32>
    %c6_i32 = arith.constant 6 : i32
    %10 = vector.broadcast %c6_i32 : i32 to vector<12x1xi32>
    %11 = arith.cmpi sge, %9, %10 : vector<12x1xi32>
    %c1_i32 = arith.constant 1 : i32
    %12 = vector.broadcast %c1_i32 : i32 to vector<12x1xi32>
    %13 = arith.subi %9, %12 : vector<12x1xi32>
    %c5_i32 = arith.constant 5 : i32
    %14 = vector.broadcast %c5_i32 : i32 to vector<12x1xi32>
    %15 = arith.subi %13, %14 : vector<12x1xi32>
    %c1_i32_4 = arith.constant 1 : i32
    %16 = vector.broadcast %c1_i32_4 : i32 to vector<12x1xi32>
    %17 = arith.subi %9, %16 : vector<12x1xi32>
    %18 = arith.select %11, %15, %17 : vector<12x1xi1>, vector<12x1xi32>
    %c0_i32 = arith.constant 0 : i32
    %19 = vector.broadcast %c0_i32 : i32 to vector<12x1xi32>
    %20 = arith.maxsi %18, %19 : vector<12x1xi32>
    %c1_i32_5 = arith.constant 1 : i32
    %21 = vector.broadcast %c1_i32_5 : i32 to vector<12x1xi32>
    %22 = arith.shli %21, %20 : vector<12x1xi32>
    %23 = arith.sitofp %22 : vector<12x1xi32> to vector<12x1xf32>
    %cst_6 = arith.constant 3.14159274 : f32
    %24 = vector.broadcast %cst_6 : f32 to vector<12x1xf32>
    %25 = arith.mulf %23, %24 : vector<12x1xf32>
    %c6_i32_7 = arith.constant 6 : i32
    %26 = vector.broadcast %c6_i32_7 : i32 to vector<12x1xi32>
    %27 = arith.cmpi sge, %9, %26 : vector<12x1xi32>
    %cst_8 = arith.constant 1.57079637 : f32
    %cst_9 = arith.constant 0.000000e+00 : f32
    %28 = vector.broadcast %cst_8 : f32 to vector<12x1xf32>
    %29 = vector.broadcast %cst_9 : f32 to vector<12x1xf32>
    %30 = arith.select %27, %28, %29 : vector<12x1xi1>, vector<12x1xf32>
    %31 = vector.broadcast %25 : vector<12x1xf32> to vector<12x128xf32>
    %32 = vector.broadcast %8 : vector<1x128xf32> to vector<12x128xf32>
    %33 = arith.mulf %31, %32 : vector<12x128xf32>
    %34 = vector.broadcast %30 : vector<12x1xf32> to vector<12x128xf32>
    %35 = arith.addf %33, %34 : vector<12x128xf32>
    %36 = math.sin %35 : vector<12x128xf32>
    %c0_i32_10 = arith.constant 0 : i32
    %37 = vector.broadcast %c0_i32_10 : i32 to vector<12x1xi32>
    %38 = arith.cmpi eq, %9, %37 : vector<12x1xi32>
    %c11_i32 = arith.constant 11 : i32
    %39 = vector.broadcast %c11_i32 : i32 to vector<12x1xi32>
    %40 = arith.cmpi eq, %9, %39 : vector<12x1xi32>
    %cst_11 = arith.constant 1.000000e+00 : f32
    %41 = vector.shape_cast %40 : vector<12x1xi1> to vector<12x1xi1>
    %42 = vector.broadcast %41 : vector<12x1xi1> to vector<12x128xi1>
    %43 = vector.broadcast %cst_11 : f32 to vector<12x128xf32>
    %44 = arith.select %42, %43, %36 : vector<12x128xi1>, vector<12x128xf32>
    %45 = vector.shape_cast %38 : vector<12x1xi1> to vector<12x1xi1>
    %46 = vector.broadcast %45 : vector<12x1xi1> to vector<12x128xi1>
    %47 = vector.shape_cast %8 : vector<1x128xf32> to vector<1x128xf32>
    %48 = vector.broadcast %47 : vector<1x128xf32> to vector<12x128xf32>
    %49 = arith.select %46, %48, %44 : vector<12x128xi1>, vector<12x128xf32>
    %c0_12 = arith.constant 0 : index
    %c0_13 = arith.constant 0 : index
    %50 = vector.load %arg2[%c0_12, %c0_13] : memref<64x12xf32, #tpu.memory_space<vmem>>, vector<64x12xf32>
    %cst_14 = arith.constant dense<0.000000e+00> : vector<64x128xf32>
    %51 = tpu.matmul %50, %49, %cst_14 {dimension_numbers = #tpu.dot_dimension_numbers<[1], [0], [0], [1], [0, 0, 1, 1], [], []>} : vector<64x12xf32>, vector<12x128xf32>, vector<64x128xf32> -> vector<64x128xf32>
    %c0_15 = arith.constant 0 : index
    %c0_16 = arith.constant 0 : index
    %52 = vector.load %arg3[%c0_15, %c0_16] : memref<67x32xf32, #tpu.memory_space<vmem>>, vector<32x32xf32>
    %c32 = arith.constant 32 : index
    %c0_17 = arith.constant 0 : index
    %53 = vector.load %arg3[%c32, %c0_17] : memref<67x32xf32, #tpu.memory_space<vmem>>, vector<32x32xf32>
    %c64 = arith.constant 64 : index
    %c0_18 = arith.constant 0 : index
    %54 = vector.load %arg3[%c64, %c0_18] : memref<67x32xf32, #tpu.memory_space<vmem>>, vector<3x32xf32>
    %c0_19 = arith.constant 0 : index
    %c0_20 = arith.constant 0 : index
    %55 = vector.load %arg4[%c0_19, %c0_20] : memref<35x1xf32, #tpu.memory_space<vmem>>, vector<32x1xf32>
    %c32_21 = arith.constant 32 : index
    %c0_22 = arith.constant 0 : index
    %56 = vector.load %arg4[%c32_21, %c0_22] : memref<35x1xf32, #tpu.memory_space<vmem>>, vector<3x1xf32>
    %57 = vector.extract_strided_slice %51 {offsets = [0, 0], sizes = [32, 128], strides = [1, 1]} : vector<64x128xf32> to vector<32x128xf32>
    %cst_23 = arith.constant 0.000000e+00 : f32
    %58 = vector.broadcast %cst_23 : f32 to vector<32x128xf32>
    %59 = arith.maximumf %57, %58 : vector<32x128xf32>
    %cst_24 = arith.constant dense<0.000000e+00> : vector<32x128xf32>
    %60 = tpu.matmul %52, %59, %cst_24 {dimension_numbers = #tpu.dot_dimension_numbers<[1], [0], [0], [1], [0, 0, 1, 1], [], []>} : vector<32x32xf32>, vector<32x128xf32>, vector<32x128xf32> -> vector<32x128xf32>
    %61 = vector.broadcast %55 : vector<32x1xf32> to vector<32x128xf32>
    %62 = arith.addf %60, %61 : vector<32x128xf32>
    %cst_25 = arith.constant 0.000000e+00 : f32
    %63 = vector.broadcast %cst_25 : f32 to vector<32x128xf32>
    %64 = arith.maximumf %62, %63 : vector<32x128xf32>
    %cst_26 = arith.constant dense<0.000000e+00> : vector<32x128xf32>
    %65 = tpu.matmul %53, %64, %cst_26 {dimension_numbers = #tpu.dot_dimension_numbers<[1], [0], [0], [1], [0, 0, 1, 1], [], []>} : vector<32x32xf32>, vector<32x128xf32>, vector<32x128xf32> -> vector<32x128xf32>
    %66 = vector.extract_strided_slice %51 {offsets = [32, 0], sizes = [32, 128], strides = [1, 1]} : vector<64x128xf32> to vector<32x128xf32>
    %67 = arith.addf %65, %66 : vector<32x128xf32>
    %cst_27 = arith.constant 0.000000e+00 : f32
    %68 = vector.broadcast %cst_27 : f32 to vector<32x128xf32>
    %69 = arith.maximumf %67, %68 : vector<32x128xf32>
    %cst_28 = arith.constant dense<0.000000e+00> : vector<3x128xf32>
    %70 = tpu.matmul %54, %69, %cst_28 {dimension_numbers = #tpu.dot_dimension_numbers<[1], [0], [0], [1], [0, 0, 1, 1], [], []>} : vector<3x32xf32>, vector<32x128xf32>, vector<3x128xf32> -> vector<3x128xf32>
    %71 = vector.broadcast %56 : vector<3x1xf32> to vector<3x128xf32>
    %72 = arith.addf %70, %71 : vector<3x128xf32>
    %c0_29 = arith.constant 0 : index
    %c0_30 = arith.constant 0 : index
    %73 = vector.load %arg5[%c0_29, %c0_30] : memref<3x128xf32, #tpu.memory_space<vmem>>, vector<3x128xf32>
    tpu.vector_store %arg5[%c0_29, %c0_30], %72 {strides = array<i32>} : memref<3x128xf32, #tpu.memory_space<vmem>>, vector<3x128xf32>,
    return
  }
  func.func @transform_0(%arg0: i32) -> (i32, i32) {
    %c0_i32 = arith.constant 0 : i32
    %c0_i32_0 = arith.constant 0 : i32
    return %c0_i32, %arg0 : i32, i32
  }
  func.func @transform_1(%arg0: i32) -> (i32, i32) {
    %c0_i32 = arith.constant 0 : i32
    %c0_i32_0 = arith.constant 0 : i32
    %c0_i32_1 = arith.constant 0 : i32
    return %c0_i32, %c0_i32_0 : i32, i32
  }
  func.func @transform_2(%arg0: i32) -> (i32, i32) {
    %c0_i32 = arith.constant 0 : i32
    %c0_i32_0 = arith.constant 0 : i32
    %c0_i32_1 = arith.constant 0 : i32
    return %c0_i32, %c0_i32_0 : i32, i32
  }
  func.func @transform_3(%arg0: i32) -> (i32, i32) {
    %c0_i32 = arith.constant 0 : i32
    %c0_i32_0 = arith.constant 0 : i32
    %c0_i32_1 = arith.constant 0 : i32
    return %c0_i32, %c0_i32_0 : i32, i32
  }
  func.func @transform_4(%arg0: i32) -> (i32, i32) {
    %c0_i32 = arith.constant 0 : i32
    %c0_i32_0 = arith.constant 0 : i32
    return %c0_i32, %arg0 : i32, i32
  }
}

</mosaic_0001>

<bundles_post_ra>
// kernel: tpu_custom_call.1
= control target key start
LH: loop header
LB: loop body
LE: loop exit
PB: predicated region body
PF: predicated region fallthrough
CT: control target
= control target key end

     0   :  { %v23_v1 = vlaneseq  ;;  %vm288_vm0 = vcmask 97280   ;;  %s1156_s0 = inlined_call_operand.vmem [shape: f32[1,128], index: 0, kind: input, shape index: {}]   ;;  %s1157_s1 = inlined_call_operand.vmem [shape: f32[64,12], index: 1, kind: input, shape index: {}]   ;;  %s1158_s2 = inlined_call_operand.vmem [shape: f32[67,32], index: 2, kind: input, shape index: {}]   ;;  %s1159_s3 = inlined_call_operand.vmem [shape: f32[35,1], index: 3, kind: input, shape index: {}]   ;;  %s1160_s4 = inlined_call_operand.hbm [shape: f32[3,128], index: 4, kind: output, shape index: {}]  }
   0x1   :  { %v18_v0 = vld [vmem:[%s1156_s0] sm:$0x1] }
   0x2   :  { %v19_v2 = vmul.f32 2.0, %v18_v0  ;;  %v963_v3 = vshrl.u32 %v23_v1, 7  ;;  %v280_v4 = vld [vmem:[%s1157_s1] sm:$0xff] }
   0x3   :  { %822 = vmatprep.mubr.msk.f32.mxu0 %vm288_vm0, %v280_v4 }
   0x4   :  { %v21_v5 = vmul.f32 0.125, %v19_v2  ;;  %v969_v6 = vadd.s32 8, %v963_v3  ;;  %v757_v7 = vadd.s32 4294967295, %v963_v3  ;;  %vm26_vm1 = vcmp.ge.s32.totalorder %v963_v3, 6 }
   0x5   :  { %9 = vsyncpa [#allocation3], 0  ;;  %v49_v13 = vsub.s32 0, %v963_v3  ;;  %v924_v15 = vmov 1   ;;  %v925_v23 = vmov 0.0   ;;  %s934_s5 = smov [#allocation2]  }
   0x6   :  { %v758_v8 = vadd.s32 4294967295, %v969_v6  ;;  %v759_v9 = vadd.s32 4294967291, %v757_v7  ;;  %v756_v10 = vadd.f32 -1.0, %v21_v5  ;;  %v44_v24 = vsel %vm26_vm1, 1.5707964, %v925_v23  ;;  %s748_s6 = sshll.u32 %s934_s5, 4  ;;  %s749_s6 = int_to_ptr.vmem [resolvable:$true] %s748_s6 }
   0x7   :  { %v926_v51 = vmov 683565275   ;;  %v927_v53 = vmov 2475754826   ;;  %v928_v55 = vmov 2131351028   ;;  %p907_p1 = scmp.lt.s32.totalorder %s749_s6, %s749_s6 }
   0x8   :  { %v760_v11 = vadd.s32 4294967291, %v758_v8  ;;  %v32_v12 = vsel %vm26_vm1, %v759_v9, %v757_v7  ;;  %v978_v19 = vrot.slane %v756_v10, %v49_v13  ;;  %v929_v59 = vmov 2102212464   ;;  %s902_s7 = scalar_lea.vmem %s749_s6, 64 }
   0x9   :  { %vm34_vm2 = vcmp.gt.s32.totalorder %v32_v12, 0  ;;  %v930_v61 = vmov 920167782   ;;  %v931_v4 = vmov 1326507024   ;;  %p903_p0 = scmp.ne.s32.totalorder %s749_s6, %s902_s7  ;;  %p908_p2 = scmp.lt.s32.totalorder %s902_s7, %s902_s7 }
   0xa   :  { %v35_v14 = vsel %vm34_vm2, %v32_v12, 0  ;;  %v39_v16 = vshll.u32 %v924_v15, %v760_v11 }
   0xb   :  { %v38_v17 = vshll.u32 %v924_v15, %v35_v14  ;;  %p909_p3 = por %p908_p2, %p907_p1 }
   0xc   :  { %v41_v18 = vcvt.s32.f32 %v39_v16 }
   0xd   :  { %v40_v20 = vcvt.s32.f32 %v38_v17  ;;  %p910_p4 = pnand %p909_p3, %p903_p0 }
   0xe   :  { %v43_v21 = vmul.f32 3.1415927, %v41_v18 }
   0xf   :  { %v42_v22 = vmul.f32 3.1415927, %v40_v20 }
  0x10   :  { %v53_v25 = vmul.f32 %v978_v19, %v43_v21 }
  0x11   :  { %v52_v26 = vmul.f32 %v978_v19, %v42_v22 }
  0x12   :  { %v985_v27 = vadd.f32 1.5707964, %v53_v25 }
  0x13   :  { %v987_v28 = vadd.f32 %v52_v26, %v44_v24 }
  0x14   :  { %v160_v29 = vand.u32 2147483647, %v985_v27  ;;  %v163_v30 = vand.u32 2139095040, %v985_v27  ;;  %vm162_vm2 = vcmp.lt.s32.totalorder %v985_v27, 0 }
  0x15   :  { %v59_v31 = vand.u32 2139095040, %v987_v28  ;;  %v56_v32 = vand.u32 2147483647, %v987_v28 }
  0x16   :  { %v164_v33 = vshrl.u32 %v163_v30, 23  ;;  %v167_v35 = vand.u32 8388607, %v160_v29 }
  0x17   :  { %v60_v34 = vshrl.u32 %v59_v31, 23  ;;  %v63_v36 = vand.u32 8388607, %v56_v32 }
  0x18   :  { %v765_v37 = vadd.s32 4294967169, %v164_v33  ;;  %v168_v41 = vor.u32 8388608, %v167_v35 }
  0x19   :  { %v761_v38 = vadd.s32 4294967169, %v60_v34  ;;  %v64_v42 = vor.u32 8388608, %v63_v36 }
  0x1a   :  { %v170_v39 = vadd.s32 1, %v765_v37  ;;  %v997_v48 = vshll.u32 %v168_v41, 8 }
  0x1b   :  { %v66_v40 = vadd.s32 1, %v761_v38  ;;  %v999_v49 = vshll.u32 %v64_v42, 8 }
  0x1c   :  { %vm171_vm3 = vcmp.gt.s32.totalorder %v170_v39, 0 }
  0x1d   :  { %vm67_vm4 = vcmp.gt.s32.totalorder %v66_v40, 0  ;;  %v172_v43 = vsel %vm171_vm3, %v170_v39, 0  ;;  %vm1051_vm3 = vcmp.le.f32.partialorder %v160_v29, 0.7853982 }
  0x1e   :  { %v68_v44 = vsel %vm67_vm4, %v66_v40, 0  ;;  %v174_v45 = vand.u32 31, %v172_v43  ;;  %v173_v47 = vshrl.u32 %v172_v43, 5  ;;  %vm58_vm4 = vcmp.lt.s32.totalorder %v987_v28, 0 }
  0x1f   :  { %v70_v46 = vand.u32 31, %v68_v44  ;;  %v1001_v57 = vshrl.u32 %v68_v44, 5 }
  0x20   :  { %v175_v50 = vsub.s32 32, %v174_v45  ;;  %v177_v52 = vshll.u32 %v926_v51, %v174_v45  ;;  %v180_v54 = vshll.u32 %v927_v53, %v174_v45  ;;  %v183_v56 = vshll.u32 %v928_v55, %v174_v45 }
  0x21   :  { %v71_v58 = vsub.s32 32, %v70_v46  ;;  %v186_v60 = vshll.u32 %v929_v59, %v174_v45  ;;  %v189_v62 = vshll.u32 %v930_v61, %v174_v45  ;;  %vm192_vm5 = vcmp.lt.s32.totalorder %v173_v47, 1 }
  0x22   :  { %v176_v63 = vshrl.u32 %v926_v51, %v175_v50  ;;  %v178_v0 = vshrl.u32 %v927_v53, %v175_v50  ;;  %v181_v1 = vshrl.u32 %v928_v55, %v175_v50  ;;  %v184_v2 = vshrl.u32 %v929_v59, %v175_v50 }
  0x23   :  { %v86_v5 = vshrl.u32 %v931_v4, %v71_v58  ;;  %v187_v7 = vshrl.u32 %v930_v61, %v175_v50  ;;  %v190_v8 = vshrl.u32 %v931_v4, %v175_v50  ;;  %vm193_vm6 = vcmp.lt.s32.totalorder %v173_v47, 2 }
  0x24   :  { %v179_v9 = vor.u32 %v178_v0, %v177_v52  ;;  %v182_v10 = vor.u32 %v181_v1, %v180_v54  ;;  %v185_v11 = vor.u32 %v184_v2, %v183_v56  ;;  %vm194_vm7 = vcmp.lt.s32.totalorder %v173_v47, 3 }
  0x25   :  { %v188_v12 = vor.u32 %v187_v7, %v186_v60  ;;  %v191_v13 = vor.u32 %v190_v8, %v189_v62  ;;  %vm195_vm8 = vcmp.lt.s32.totalorder %v173_v47, 4  ;;  %v73_v22 = vshll.u32 %v926_v51, %v70_v46 }
  0x26   :  { %v196_v14 = vsel %vm192_vm5, %v176_v63, %v179_v9  ;;  %v197_v15 = vsel %vm195_vm8, %v185_v11, 2102212464  ;;  %v200_v16 = vsel %vm192_vm5, %v179_v9, %v182_v10  ;;  %v204_v17 = vsel %vm192_vm5, %v182_v10, %v185_v11 }
  0x27   :  { %v198_v18 = vsel %vm194_vm7, %v182_v10, %v197_v15  ;;  %v201_v20 = vsel %vm195_vm8, %v188_v12, 920167782  ;;  %v205_v21 = vsel %vm195_vm8, %v191_v13, 1326507024  ;;  %v72_v26 = vshrl.u32 %v926_v51, %v71_v58 }
  0x28   :  { %v202_v24 = vsel %vm194_vm7, %v185_v11, %v201_v20  ;;  %v206_v25 = vsel %vm194_vm7, %v188_v12, %v205_v21  ;;  %v74_v30 = vshrl.u32 %v927_v53, %v71_v58  ;;  %v199_v31 = vsel %vm193_vm6, %v196_v14, %v198_v18 }
  0x29   :  { %v203_v33 = vsel %vm193_vm6, %v200_v16, %v202_v24  ;;  %v207_v34 = vsel %vm193_vm6, %v204_v17, %v206_v25  ;;  %v76_v35 = vshll.u32 %v927_v53, %v70_v46  ;;  %v77_v41 = vshrl.u32 %v928_v55, %v71_v58 }
  0x2a   :  { %v1007_v36 = vmul.u32.u64.low %v997_v48, %v207_v34  ;;  %v1008_v37 = vmul.u32.u64.high %v997_v48, %v207_v34, %v1007_v36  ;;  %v1011_v38 = vmul.u32.u64.low %v997_v48, %v203_v33  ;;  %v1012_v39 = vmul.u32.u64.high %v997_v48, %v203_v33, %v1011_v38 }
  0x2b   :  { %v75_v40 = vor.u32 %v74_v30, %v73_v22  ;;  %v79_v42 = vshll.u32 %v928_v55, %v70_v46  ;;  %v80_v43 = vshrl.u32 %v929_v59, %v71_v58  ;;  %v82_v44 = vshll.u32 %v929_v59, %v70_v46 }
  0x2c   :  { %v83_v45 = vshrl.u32 %v930_v61, %v71_v58  ;;  %v85_v50 = vshll.u32 %v930_v61, %v70_v46  ;;  %vm88_vm9 = vcmp.lt.s32.totalorder %v1001_v57, 1  ;;  %v215_v47 = vmul.u32 %v997_v48, %v199_v31 }
  0x2d   :  { %v78_v51 = vor.u32 %v77_v41, %v76_v35  ;;  %v81_v52 = vor.u32 %v80_v43, %v79_v42  ;;  %vm89_vm10 = vcmp.lt.s32.totalorder %v1001_v57, 2  ;;  %vm217_vm11 = vc.u32 %v1008_v37, %v1011_v38 }
  0x2e   :  { %v218_v53 = vadd.s32 1, %v1012_v39  ;;  %v84_v54 = vor.u32 %v83_v45, %v82_v44  ;;  %vm90_vm12 = vcmp.lt.s32.totalorder %v1001_v57, 3  ;;  %v87_v55 = vor.u32 %v86_v5, %v85_v50 }
  0x2f   :  { %vm91_vm13 = vcmp.lt.s32.totalorder %v1001_v57, 4  ;;  %v92_v46 = vsel %vm88_vm9, %v72_v26, %v75_v40  ;;  %v96_v48 = vsel %vm88_vm9, %v75_v40, %v78_v51  ;;  %v100_v60 = vsel %vm88_vm9, %v78_v51, %v81_v52 }
  0x30   :  { %v219_v56 = vsel %vm217_vm11, %v218_v53, %v1012_v39  ;;  %v93_v58 = vsel %vm91_vm13, %v81_v52, 2102212464  ;;  %v97_v59 = vsel %vm91_vm13, %v84_v54, 920167782  ;;  %v101_v0 = vsel %vm91_vm13, %v87_v55, 1326507024 }
  0x31   :  { %v220_v61 = vadd.s32 %v219_v56, %v215_v47  ;;  %v94_v62 = vsel %vm90_vm12, %v78_v51, %v93_v58  ;;  %v98_v63 = vsel %vm90_vm12, %v81_v52, %v97_v59  ;;  %v102_v4 = vsel %vm90_vm12, %v84_v54, %v101_v0  ;;  %v426_v58 = vld [vmem:[%s1158_s2 + $0x20] sm:$0xff] }
  0x32   :  { %v95_v1 = vsel %vm89_vm10, %v92_v46, %v94_v62  ;;  %v99_v2 = vsel %vm89_vm10, %v96_v48, %v98_v63  ;;  %v103_v7 = vsel %vm89_vm10, %v100_v60, %v102_v4  ;;  %v216_v31 = vadd.s32 %v1011_v38, %v1008_v37 }
  0x33   :  { %v221_v5 = vadd.s32 536870912, %v220_v61  ;;  %v1035_v8 = vmul.u32.u64.low %v999_v49, %v99_v2  ;;  %v1036_v9 = vmul.u32.u64.high %v999_v49, %v99_v2, %v1035_v8  ;;  %v111_v13 = vmul.u32 %v999_v49, %v95_v1 }
  0x34   :  { %v1039_v10 = vmul.u32.u64.low %v999_v49, %v103_v7  ;;  %v1040_v11 = vmul.u32.u64.high %v999_v49, %v103_v7, %v1039_v10  ;;  %vm57_vm5 = vcmp.le.f32.partialorder %v56_v32, 0.7853982  ;;  %vm252_vm9 = vweird.f32 %v985_v27 }
  0x35   :  { %v222_v12 = vshrl.u32 %v221_v5, 30  ;;  %v114_v15 = vadd.s32 1, %v1036_v9  ;;  %vm267_vm10 = vcmp.eq.s32.totalorder %v969_v6, 11  ;;  %vm313_vm11 = vcmask 1043456  }
  0x36   :  { %vm113_vm14 = vc.u32 %v1040_v11, %v1035_v8  ;;  %v112_v51 = vadd.s32 %v1035_v8, %v1040_v11 }
  0x37   :  { %v223_v14 = vshll.u32 %v222_v12, 30  ;;  %v115_v57 = vsel %vm113_vm14, %v114_v15, %v1036_v9  ;;  %v246_v46 = vsub.s32 4, %v222_v12 }
  0x38   :  { %v116_v17 = vadd.s32 %v115_v57, %v111_v13 }
  0x39   :  { %v224_v16 = vsub.s32 %v220_v61, %v223_v14  ;;  %v247_v63 = vsel %vm162_vm2, %v246_v46, %v222_v12  ;;  %v425_v46 = vld [vmem:[%s1158_s2 + $0x18] sm:$0xff] }
  0x3a   :  { %v117_v20 = vadd.s32 536870912, %v116_v17  ;;  %v249_v29 = vsel %vm1051_vm3, 0, %v247_v63 }
  0x3b   :  { %v226_v18 = vsub.s32 0, %v224_v16  ;;  %v253_v8 = vadd.s32 3, %v249_v29 }
  0x3c   :  { %v118_v22 = vshrl.u32 %v117_v20, 30 }
  0x3d   :  { %v766_v21 = vmin.u32 %v226_v18, %v224_v16  ;;  %v254_v13 = vand.u32 3, %v253_v8 }
  0x3e   :  { %v119_v25 = vshll.u32 %v118_v22, 30  ;;  %v142_v7 = vsub.s32 4, %v118_v22 }
  0x3f   :  { %v228_v24 = vclz %v766_v21  ;;  %vm259_vm6 = vcmp.eq.s32.totalorder %v254_v13, 2  ;;  %vm256_vm7 = vcmp.eq.s32.totalorder %v254_v13, 0  ;;  %vm255_vm8 = vcmp.lt.s32.totalorder %v254_v13, 2 }
  0x40   :  { %v120_v30 = vsub.s32 %v116_v17, %v119_v25  ;;  %v143_v11 = vsel %vm58_vm4, %v142_v7, %v118_v22 }
  0x41   :  { %v767_v26 = vadd.s32 4294967294, %v228_v24  ;;  %v145_v14 = vsel %vm57_vm5, 0, %v143_v11 }
  0x42   :  { %v122_v33 = vsub.s32 0, %v120_v30  ;;  %v149_v17 = vadd.s32 3, %v145_v14  ;;  %v427_v14 = vld [vmem:[%s1158_s2 + $0x28] sm:$0xff] }
  0x43   :  { %vm768_vm15 = vcmp.lt.s32.totalorder %v767_v26, 0 }
  0x44   :  { %v231_v49 = vsel %vm768_vm15, 0, %v767_v26  ;;  %v762_v39 = vmin.u32 %v122_v33, %v120_v30  ;;  %v150_v22 = vand.u32 3, %v149_v17  ;;  %vm148_vm15 = vweird.f32 %v987_v28 }
  0x45   :  { %v232_v34 = vsub.s32 32, %v231_v49  ;;  %v233_v35 = vshll.u32 %v224_v16, %v231_v49  ;;  %v236_v36 = vsub.s32 4294967266, %v231_v49 }
  0x46   :  { %v124_v42 = vclz %v762_v39  ;;  %vm155_vm12 = vcmp.eq.s32.totalorder %v150_v22, 2  ;;  %vm152_vm13 = vcmp.eq.s32.totalorder %v150_v22, 0  ;;  %vm151_vm14 = vcmp.lt.s32.totalorder %v150_v22, 2  ;;  %v282_v39 = vld [vmem:[%s1157_s1 + $0x10] sm:$0xff] }
  0x47   :  { %v234_v40 = vshrl.u32 %v216_v31, %v232_v34  ;;  %v237_v41 = vadd.s32 127, %v236_v36  ;;  %v281_v36 = vld [vmem:[%s1157_s1 + $0x8] sm:$0xff] }
  0x48   :  { %v763_v45 = vadd.s32 4294967294, %v124_v42  ;;  %v433_v42 = vld [vmem:[%s1159_s3 + $0x10] sm:$0xff] }
  0x49   :  { %v235_v43 = vor.u32 %v234_v40, %v233_v35  ;;  %v238_v44 = vshll.u32 %v237_v41, 23  ;;  %v432_v40 = vld [vmem:[%s1159_s3 + $0x8] sm:$0xff]  ;;  %v932_v41 = vmov 0  }
  0x4a   :  { %vm764_vm1 = vcmp.lt.s32.totalorder %v763_v45, 0  ;;  %892 = vset.pattern.permute.xlu0 %v932_v41  ;;  %893 = vset.pattern.permute.xlu1 %v932_v41 }
  0x4b   :  { %v239_v50 = vor.u32 4788187, %v238_v44  ;;  %v242_v47 = vcvt.s32.f32 %v235_v43  ;;  %v127_v37 = vsel %vm764_vm1, 0, %v763_v45  ;;  %vm264_vm1 = vcmp.eq.s32.totalorder %v963_v3, 0  ;;  %v283_v3 = vld [vmem:[%s1157_s1 + $0x18] sm:$0xff]  ;;  %447 = vperm.xlu1 %893, %v432_v40   ;;  %v431_v43 = vld [vmem:[%s1159_s3] sm:$0xff] }
  0x4c   :  { %v128_v38 = vsub.s32 32, %v127_v37  ;;  %v129_v53 = vshll.u32 %v120_v30, %v127_v37  ;;  %v132_v54 = vsub.s32 4294967266, %v127_v37  ;;  %v435_v44 = vld [vmem:[%s1159_s3 + $0x20] sm:$0x7] }
  0x4d   :  { %v240_v52 = vand.u32 2147483647, %v239_v50 }
  0x4e   :  { %v130_v48 = vshrl.u32 %v112_v51, %v128_v38  ;;  %v133_v56 = vadd.s32 127, %v132_v54  ;;  %v423_v54 = vld [vmem:[%s1158_s2 + $0x8] sm:$0xff] }
  0x4f   :  { %v243_v55 = vmul.f32 %v242_v47, %v240_v52  ;;  %442 = vperm.xlu1 %893, %v431_v43  }
  0x50   :  { %v131_v60 = vor.u32 %v130_v48, %v129_v53  ;;  %v134_v61 = vshll.u32 %v133_v56, 23  ;;  %v284_v48 = vld [vmem:[%s1157_s1 + $0x20] sm:$0xff]  ;;  %v285_v56 = vld [vmem:[%s1157_s1 + $0x28] sm:$0xff] }
  0x51   :  { %v244_v59 = vxor.u32 2147483648, %v243_v55 }
  0x52   :  { %v135_v1 = vor.u32 4788187, %v134_v61  ;;  %v138_v2 = vcvt.s32.f32 %v131_v60  ;;  %v287_v60 = vld [vmem:[%s1157_s1 + $0x38] sm:$0xff] }
  0x53   :  { %v245_v62 = vsel %vm162_vm2, %v244_v59, %v243_v55  ;;  %vm460_vm2 = vcmask 261120   ;;  %v424_v55 = vld [vmem:[%s1158_s2 + $0x10] sm:$0xff] }
  0x54   :  { %v248_v0 = vsel %vm1051_vm3, %v985_v27, %v245_v62  ;;  %v136_v4 = vand.u32 2147483647, %v135_v1  ;;  %v286_v59 = vld [vmem:[%s1157_s1 + $0x30] sm:$0xff] }
  0x55   :  { %894 = vcosq.f32 %v248_v0 }
  0x56   :  { %896 = vsinq.f32 %v248_v0  ;;  %v139_v5 = vmul.f32 %v138_v2, %v136_v4 }
  0x58   :  { %v140_v9 = vxor.u32 2147483648, %v139_v5 }
  0x5a   :  { %v141_v10 = vsel %vm58_vm4, %v140_v9, %v139_v5 }
  0x5b   :  { %v144_v12 = vsel %vm57_vm5, %v987_v28, %v141_v10  ;;  %v434_v28 = vld [vmem:[%s1159_s3 + $0x18] sm:$0xff] }
  0x5c   :  { %898 = vcosq.f32 %v144_v12  ;;  %457 = vperm.xlu0 %892, %v434_v28  }
  0x5d   :  { %900 = vsinq.f32 %v144_v12 }
  0x60   :  { %452 = vperm.xlu0 %892, %v433_v42  }
  0x62   :  { %v895_v15 = vpop.eup %894 }
  0x63   :  { %v897_v16 = vpop.eup %896  ;;  %v260_v57 = vxor.u32 2147483648, %v895_v15 }
  0x64   :  { %v257_v18 = vxor.u32 2147483648, %v897_v16  ;;  %665 = vperm.xlu0 %892, %v435_v44  }
  0x65   :  { %v261_v32 = vsel %vm259_vm6, %v260_v57, %v897_v16  ;;  %v429_v16 = vld [vmem:[%s1158_s2 + $0x38] sm:$0xff] }
  0x66   :  { %v258_v20 = vsel %vm256_vm7, %v895_v15, %v257_v18  ;;  %v428_v15 = vld [vmem:[%s1158_s2 + $0x30] sm:$0xff] }
  0x67   :  { %v262_v21 = vsel %vm255_vm8, %v258_v20, %v261_v32 }
  0x68   :  { %v263_v24 = vsel %vm252_vm9, nan, %v262_v21 }
  0x69   :  { %v273_v25 = vsel %vm267_vm10, 1.0, %v263_v24  ;;  %v899_v26 = vpop.eup %898 }
  0x6a   :  { %818 = vmatprep.subr.msk.mxu0 %vm313_vm11, %v273_v25  ;;  %v901_v30 = vpop.eup %900  ;;  %v156_v31 = vxor.u32 2147483648, %v899_v26 }
  0x6b   :  { %819 = vmatpush3.msk.msra.mxu0 %vm313_vm11, %v273_v25  ;;  %v153_v49 = vxor.u32 2147483648, %v901_v30 }
  0x6c   :  { %v157_v27 = vsel %vm155_vm12, %v156_v31, %v901_v30 }
  0x6d   :  { %v154_v33 = vsel %vm152_vm13, %v899_v26, %v153_v49 }
  0x6e   :  { %v158_v6 = vsel %vm151_vm14, %v154_v33, %v157_v27 }
  0x6f   :  { %v159_v34 = vsel %vm148_vm15, nan, %v158_v6 }
  0x70   :  { %v278_v35 = vsel %vm264_vm1, %v978_v19, %v159_v34  ;;  %v422_v19 = vld [vmem:[%s1158_s2] sm:$0xff] }
  0x71   :  { %820 = vmatprep.subr.mxu0 %v278_v35  ;;  %842 = vmatprep.mubr.msk.f32.mxu1 %vm460_vm2, %v422_v19  ;;  %v430_v34 = vld [vmem:[%s1158_s2 + $0x40] sm:$0x7] }
  0x72   :  { %821 = vmatpush3.msra.mxu0 %v278_v35 }
  0x73   :  { %823 = vmatmul.mubr.msk.f32.vlgmr.msra.gmra.mxu0 %vm288_vm0, %v281_v36  ;;  %862 = vmatprep.subr.mxu0 %v925_v23 }
  0x74   :  { %825 = vmatprep.mubr.msk.f32.mxu0 %vm288_vm0, %v282_v39 }
  0x77   :  { %826 = vmatmul.mubr.msk.f32.gmra.mxu0 %vm288_vm0, %v283_v3 }
  0x78   :  { %828 = vmatprep.mubr.msk.f32.mxu0 %vm288_vm0, %v284_v48 }
  0x7b   :  { %829 = vmatmul.mubr.msk.f32.gmra.mxu0 %vm288_vm0, %v285_v56 }
  0x7c   :  { %831 = vmatprep.mubr.msk.f32.mxu0 %vm288_vm0, %v286_v59 }
  0x7f   :  { %832 = vmatmul.mubr.msk.f32.gmra.mxu0 %vm288_vm0, %v287_v60  ;;  %vm933_vm0 = vmmov 0  }
  0x80   :  { %870 = vmatprep.mubr.msk.f32.mxu0 %vm933_vm0, %v925_v23 }
  0xc6   :  { %v448_v62 = vpop.permute.xlu1 %447 }
  0xca   :  { %v443_v29 = vpop.permute.xlu1 %442 }
  0xd7   :  { %v458_v61 = vpop.permute.xlu0 %457 }
  0xdb   :  { %v453_v2 = vpop.permute.xlu0 %452 }
  0xdf   :  { %v666_v35 = vpop.permute.xlu0 %665 }
 0x133   :  { %v824_v45 = vpop.f32.mrf.mxu0 }
 0x134   :  { %v437_v38 = vmax.f32 %v824_v45, 0.0 }
 0x135   :  { %v383_v50 = vpop.f32.mrf.mxu0 }
 0x136   :  { %v436_v53 = vmax.f32 %v383_v50, 0.0 }
 0x137   :  { %v827_v47 = vpop.f32.mrf.mxu0 }
 0x138   :  { %v439_v51 = vmax.f32 %v827_v47, 0.0 }
 0x139   :  { %v393_v52 = vpop.f32.mrf.mxu0 }
 0x13a   :  { %v438_v37 = vmax.f32 %v393_v52, 0.0  ;;  %834 = vmatprep.subr.mxu1 %v439_v51 }
 0x13b   :  { %835 = vmatpush3.msra.mxu1 %v439_v51  ;;  %v830_v57 = vpop.f32.mrf.mxu0 }
 0x13c   :  { %836 = vmatprep.subr.mxu1 %v438_v37 }
 0x13d   :  { %837 = vmatpush3.msra.mxu1 %v438_v37  ;;  %v403_v17 = vpop.f32.mrf.mxu0 }
 0x13e   :  { %838 = vmatprep.subr.mxu1 %v437_v38 }
 0x13f   :  { %839 = vmatpush3.msra.mxu1 %v437_v38  ;;  %v833_v32 = vpop.f32.mrf.mxu0 }
 0x140   :  { %840 = vmatprep.subr.mxu1 %v436_v53 }
 0x141   :  { %841 = vmatpush3.msra.mxu1 %v436_v53  ;;  %v413_v24 = vpop.f32.mrf.mxu0 }
 0x142   :  { %843 = vmatmul.mubr.msk.f32.vlgmr.msra.gmra.mxu1 %vm460_vm2, %v423_v54 }
 0x143   :  { %845 = vmatprep.mubr.msk.f32.mxu1 %vm460_vm2, %v424_v55 }
 0x146   :  { %846 = vmatmul.mubr.msk.f32.gmra.mxu1 %vm460_vm2, %v425_v46 }
 0x147   :  { %856 = vmatprep.mubr.msk.f32.mxu1 %vm460_vm2, %v426_v58 }
 0x202   :  { %v844_v63 = vpop.f32.mrf.mxu1 }
 0x203   :  { %v545_v7 = vadd.f32 %v844_v63, %v448_v62 }
 0x204   :  { %v539_v0 = vpop.f32.mrf.mxu1 }
 0x205   :  { %v540_v10 = vadd.f32 %v539_v0, %v443_v29  ;;  %v559_v12 = vmax.f32 %v545_v7, 0.0 }
 0x206   :  { %v847_v1 = vpop.f32.mrf.mxu1 }
 0x207   :  { %v555_v4 = vadd.f32 %v847_v1, %v458_v61  ;;  %v558_v13 = vmax.f32 %v540_v10, 0.0 }
 0x208   :  { %v549_v5 = vpop.f32.mrf.mxu1 }
 0x209   :  { %v561_v8 = vmax.f32 %v555_v4, 0.0  ;;  %v550_v9 = vadd.f32 %v549_v5, %v453_v2 }
 0x20b   :  { %v560_v11 = vmax.f32 %v550_v9, 0.0  ;;  %848 = vmatprep.subr.mxu1 %v561_v8 }
 0x20c   :  { %849 = vmatpush3.msra.mxu1 %v561_v8 }
 0x20d   :  { %850 = vmatprep.subr.mxu1 %v560_v11 }
 0x20e   :  { %851 = vmatpush3.msra.mxu1 %v560_v11 }
 0x20f   :  { %852 = vmatprep.subr.mxu1 %v559_v12 }
 0x210   :  { %853 = vmatpush3.msra.mxu1 %v559_v12 }
 0x211   :  { %854 = vmatprep.subr.mxu1 %v558_v13 }
 0x212   :  { %855 = vmatpush3.msra.mxu1 %v558_v13 }
 0x213   :  { %857 = vmatmul.mubr.msk.f32.vlgmr.msra.gmra.mxu1 %vm460_vm2, %v427_v14 }
 0x214   :  { %859 = vmatprep.mubr.msk.f32.mxu1 %vm460_vm2, %v428_v15 }
 0x217   :  { %860 = vmatmul.mubr.msk.f32.gmra.mxu1 %vm460_vm2, %v429_v16 }
 0x2d3   :  { %v858_v18 = vpop.f32.mrf.mxu1 }
 0x2d4   :  { %v646_v26 = vadd.f32 %v858_v18, %v830_v57 }
 0x2d5   :  { %v640_v20 = vpop.f32.mrf.mxu1 }
 0x2d6   :  { %v641_v49 = vadd.f32 %v640_v20, %v403_v17  ;;  %v660_v33 = vmax.f32 %v646_v26, 0.0 }
 0x2d7   :  { %v861_v21 = vpop.f32.mrf.mxu1 }
 0x2d8   :  { %v656_v22 = vadd.f32 %v861_v21, %v833_v32  ;;  %v659_v6 = vmax.f32 %v641_v49, 0.0 }
 0x2d9   :  { %v650_v25 = vpop.f32.mrf.mxu1 }
 0x2da   :  { %v662_v30 = vmax.f32 %v656_v22, 0.0  ;;  %v651_v31 = vadd.f32 %v650_v25, %v413_v24 }
 0x2dc   :  { %v661_v27 = vmax.f32 %v651_v31, 0.0  ;;  %863 = vmatpush3.msra.mxu0 %v662_v30 }
 0x2dd   :  { %864 = vmatprep.subr.mxu0 %v925_v23 }
 0x2de   :  { %865 = vmatpush3.msra.mxu0 %v661_v27 }
 0x2df   :  { %866 = vmatprep.subr.mxu0 %v925_v23 }
 0x2e0   :  { %867 = vmatpush3.msra.mxu0 %v660_v33 }
 0x2e1   :  { %868 = vmatprep.subr.mxu0 %v925_v23 }
 0x2e2   :  { %869 = vmatpush3.msra.mxu0 %v659_v6 }
 0x2e3   :  { %871 = vmatmul.mubr.msk.f32.vlgmr.msra.gmra.mxu0 %vm460_vm2, %v430_v34 }
 0x3a3   :  { %v737_v36 = vpop.f32.mrf.mxu0 }
 0x3a4   :  { %v738_v39 = vadd.f32 %v737_v36, %v666_v35 }
 0x3a5   :  { %v872_v3 = vpop.f32.mrf.mxu0 }
 0x3a6   :  { %741 = vst [vmem:[#allocation2] sm:$0x7] %v738_v39 }
 0x3a7   :  { %913 = shalt.err (!%p910_p4)
}
 0x3a8   :  { %751 = dma.vmem_to_hbm [thread:$0]  %s749_s6, 64, %s1160_s4, [#allocation3]  }
 0x3a9   :  { %922 = dma.done.wait [#allocation3], 64  }
 0x3aa   :  { %923 = vsyncadd [#allocation3], 4294967232 }
 0x3ab   :  { %755 = vsyncpa [#allocation3], 1 }

</bundles_post_ra>
